<compile_context>
chip_gen: v7x
topology: tpu7x:2x2x1
jax: 0.10.0
libtpu: 0.0.40
codegen_flags: <defaults>
</compile_context>

<pallas_src>
import functools
import math

import jax
import jax.numpy as jnp
import numpy as np
from jax.experimental import pallas as pl
from jax.experimental.pallas import tpu as pltpu

PI = math.pi
TWO_PI = 2.0 * math.pi


def tau_iter(method, iter_frac, tau_min, tau_max, r=None):
    if "softmax" in method:
        if r is None:
            r = math.log(tau_max / tau_min)
        return max(tau_min, tau_max * math.exp(-r * iter_frac))
    elif "sigmoid" in method or "poly" in method:
        return 1.0 + 10.0 * iter_frac
    return None


def _wrap_mod(x):
    # torch-style (x + pi) % (2*pi) - pi ; valid for unbounded x.
    return jnp.mod(x + PI, TWO_PI) - PI


def _wrap_select(d, half, full):
    # Wrap a value known to lie in (-2*half, 2*half) into [-half, half).
    return jnp.where(d >= half, d - full, jnp.where(d < -half, d + full, d))


def _softmax_quant_kernel(x_ref, o_ref, *, lut_vals, lut_scaled, s, K, offset,
                          hard):
    n = len(lut_vals)
    x = x_ref[...].astype(jnp.float32)
    # Only the initial wrap needs the mod form (input range is unbounded).
    w = _wrap_mod(x + offset)
    # Pre-scale by s/pi so per-level work is: sub, select-wrap (threshold +-s).
    w_s = w * (s / PI)
    two_s = 2.0 * s

    def z_level(l):
        return _wrap_select(w_s - lut_scaled[l], s, two_s)

    if hard:
        # argmax_l softmax == argmax_l score == argmin_l |z_l|
        # (sig(z)(1-sig(z)) is even and strictly decreasing in |z|).
        best = jnp.abs(z_level(0))
        q = jnp.full_like(w_s, lut_vals[0])
        for l in range(1, n):
            a = jnp.abs(z_level(l))
            upd = a < best            # strict '<' keeps first index on ties
            best = jnp.where(upd, a, best)
            q = jnp.where(upd, lut_vals[l], q)
    else:
        # Numerically-stable softmax with the 4*c*s/tau factor folded into K.
        gs = []
        for l in range(n):
            sig = jax.nn.sigmoid(z_level(l))
            gs.append(sig * (1.0 - sig))
        m = gs[0]
        for l in range(1, n):
            m = jnp.maximum(m, gs[l])
        num = jnp.zeros_like(w_s)
        den = jnp.zeros_like(w_s)
        for l in range(n):
            e = jnp.exp((gs[l] - m) * K)
            num = num + e * lut_vals[l]
            den = den + e
        q = num / den

    o_ref[...] = q.astype(o_ref.dtype)


def pallas_softmax_quantization(phase, lut, *, tau, tau_max, c, offset,
                                hard=True, lanes=128, max_row_tile=512):
    """phase: any-shape float array. lut: (L,) float32 (static). Returns same shape."""
    orig_shape = phase.shape
    orig_dtype = phase.dtype
    flat = phase.reshape(-1).astype(jnp.float32)
    total = int(flat.shape[0])

    # Pad the flattened array (instead of asserting) so rows are a multiple of
    # the row tile and the last dim is lane-dense (128).
    rows = -(-total // lanes)
    row_tile = min(int(max_row_tile), ((rows + 7) // 8) * 8)
    padded_rows = -(-rows // row_tile) * row_tile
    padded_total = padded_rows * lanes
    if padded_total != total:
        flat = jnp.pad(flat, (0, padded_total - total))
    x2d = flat.reshape(padded_rows, lanes)

    # Static LUT -> bake values in as Python constants (no SMEM reads/splats).
    lut_vals = tuple(float(v) for v in np.asarray(lut, dtype=np.float64))
    s = float(tau_max) / float(tau)
    K = 4.0 * float(c) * s / float(tau)
    lut_scaled = tuple(v * (s / PI) for v in lut_vals)

    kernel = functools.partial(
        _softmax_quant_kernel, lut_vals=lut_vals, lut_scaled=lut_scaled,
        s=s, K=K, offset=float(offset), hard=bool(hard))

    out = pl.pallas_call(
        kernel,
        out_shape=jax.ShapeDtypeStruct((padded_rows, lanes), jnp.float32),
        grid=(padded_rows // row_tile,),
        in_specs=[pl.BlockSpec((row_tile, lanes), lambda i: (i, 0))],
        out_specs=pl.BlockSpec((row_tile, lanes), lambda i: (i, 0)),
        compiler_params=pltpu.CompilerParams(
            dimension_semantics=("parallel",)),
    )(x2d)

    out = out.reshape(-1)[:total].reshape(orig_shape)
    return out.astype(orig_dtype)


def reference_quantization(phase, lut, *, tau, tau_max, c, offset, hard):
    """Pure-JAX transcription of the torch forward (softmax, non-gumbel)."""
    w = _wrap_mod(phase + offset)
    w = _wrap_mod(w)
    lut4 = lut.reshape(1, -1, 1, 1)
    s = tau_max / tau
    d = _wrap_mod(w - lut4) / PI
    sig = jax.nn.sigmoid(s * d)
    scores = sig * (1.0 - sig) * 4.0 * c * (tau_max / tau)
    y = jax.nn.softmax(scores / tau, axis=1)
    if hard:
        idx = jnp.argmax(y, axis=1, keepdims=True)
        one_hot = (jnp.arange(lut.shape[0]).reshape(1, -1, 1, 1) == idx)
        one_hot = one_hot.astype(jnp.float32)
    else:
        one_hot = y
    return jnp.sum(one_hot * lut4, axis=1, keepdims=True)


if __name__ == "__main__":
    # Mirrors Quantization.__init__ with method='softmax', lut=None.
    num_bits = 4
    tau_min, tau_max, c, offset = 0.5, 3.0, 300.0, 0.0
    method = "softmax"
    full_lut = jnp.linspace(-PI, PI, 2 ** num_bits + 1)   # DiscreteSLM.lut (17,)
    lut = full_lut[:-1]                                    # (16,) passed to the quantizer

    iter_frac = 0.3
    tau = tau_iter(method, iter_frac, tau_min, tau_max)

    key = jax.random.PRNGKey(0)

    def run_case(shape, hard, max_row_tile=512):
        phase = jax.random.uniform(key, shape, jnp.float32,
                                   minval=-2.0 * PI, maxval=2.0 * PI)
        q = pallas_softmax_quantization(phase, lut, tau=tau, tau_max=tau_max,
                                        c=c, offset=offset, hard=hard,
                                        max_row_tile=max_row_tile)
        q = jax.block_until_ready(q)
        ref = reference_quantization(phase, lut, tau=tau, tau_max=tau_max,
                                     c=c, offset=offset, hard=hard)
        assert q.shape == shape
        err = float(jnp.max(jnp.abs(q - ref)))
        # Hard path returns exact LUT entries; soft path's softmax amplifies
        # float rounding (logits ~ O(300)), so allow a looser absolute bound.
        tol = 1e-6 if hard else 2e-3
        return err, tol

    ok = True
    cases = [
        ((2, 1, 16, 64), True, 512),   # main demo shape, hard (inference path)
        ((2, 1, 16, 64), False, 512),  # main demo shape, soft
        ((2, 1, 16, 64), True, 8),     # exercise grid > 1
        ((1, 1, 13, 37), True, 512),   # non-multiple-of-128: padding/slicing
        ((1, 1, 13, 37), False, 512),
    ]
    for shape, hard, mrt in cases:
        err, tol = run_case(shape, hard, max_row_tile=mrt)
        if err > tol:
            ok = False
            print(f"mismatch shape={shape} hard={hard}: max abs err = {err} (tol {tol})")

    if ok:
        print("KERNEL_OK")
</pallas_src>

<mosaic_0001>
module attributes {stable_mosaic.version = 11 : i64} {
  func.func @_softmax_quant_kernel(%arg0: i32, %arg1: memref<16x128xf32, #tpu.memory_space<vmem>>, %arg2: memref<16x128xf32, #tpu.memory_space<vmem>>) attributes {dimension_semantics = [#tpu.dimension_semantics<parallel>], iteration_bounds = array<i64: 1>, scalar_prefetch = 0 : i64, scratch_operands = 0 : i64, tpu.core_type = #tpu.core_type<tc>, window_params = [{transform_indices = @transform_0, window_bounds = array<i64: 16, 128>}, {transform_indices = @transform_1, window_bounds = array<i64: 16, 128>}]} {
    %c0 = arith.constant 0 : index
    %c0_0 = arith.constant 0 : index
    %0 = vector.load %arg1[%c0, %c0_0] : memref<16x128xf32, #tpu.memory_space<vmem>>, vector<16x128xf32>
    %cst = arith.constant 0.000000e+00 : f32
    %1 = vector.broadcast %cst : f32 to vector<16x128xf32>
    %2 = arith.addf %0, %1 : vector<16x128xf32>
    %cst_1 = arith.constant 3.14159274 : f32
    %3 = vector.broadcast %cst_1 : f32 to vector<16x128xf32>
    %4 = arith.addf %2, %3 : vector<16x128xf32>
    %cst_2 = arith.constant 6.28318548 : f32
    %5 = vector.broadcast %cst_2 : f32 to vector<16x128xf32>
    %6 = arith.remf %4, %5 : vector<16x128xf32>
    %cst_3 = arith.constant 0.000000e+00 : f32
    %7 = vector.broadcast %cst_3 : f32 to vector<16x128xf32>
    %8 = arith.cmpf one, %6, %7 : vector<16x128xf32>
    %cst_4 = arith.constant 0.000000e+00 : f32
    %9 = vector.broadcast %cst_4 : f32 to vector<16x128xf32>
    %10 = arith.cmpf olt, %6, %9 : vector<16x128xf32>
    %cst_5 = arith.constant 0.000000e+00 : f32
    %11 = arith.cmpf olt, %cst_2, %cst_5 : f32
    %12 = vector.broadcast %11 : i1 to vector<16x128xi1>
    %13 = vector.broadcast %12 : vector<16x128xi1> to vector<16x128xi1>
    %14 = arith.xori %10, %13 : vector<16x128xi1>
    %15 = arith.andi %14, %8 : vector<16x128xi1>
    %16 = vector.broadcast %cst_2 : f32 to vector<16x128xf32>
    %17 = arith.addf %6, %16 : vector<16x128xf32>
    %18 = arith.select %15, %17, %6 : vector<16x128xi1>, vector<16x128xf32>
    %cst_6 = arith.constant 3.14159274 : f32
    %19 = vector.broadcast %cst_6 : f32 to vector<16x128xf32>
    %20 = arith.subf %18, %19 : vector<16x128xf32>
    %cst_7 = arith.constant 0.544873297 : f32
    %21 = vector.broadcast %cst_7 : f32 to vector<16x128xf32>
    %22 = arith.mulf %20, %21 : vector<16x128xf32>
    %cst_8 = arith.constant -1.71176994 : f32
    %23 = vector.broadcast %cst_8 : f32 to vector<16x128xf32>
    %24 = arith.subf %22, %23 : vector<16x128xf32>
    %cst_9 = arith.constant 1.71176982 : f32
    %25 = vector.broadcast %cst_9 : f32 to vector<16x128xf32>
    %26 = arith.cmpf oge, %24, %25 : vector<16x128xf32>
    %cst_10 = arith.constant 3.42353964 : f32
    %27 = vector.broadcast %cst_10 : f32 to vector<16x128xf32>
    %28 = arith.subf %24, %27 : vector<16x128xf32>
    %cst_11 = arith.constant -1.71176982 : f32
    %29 = vector.broadcast %cst_11 : f32 to vector<16x128xf32>
    %30 = arith.cmpf olt, %24, %29 : vector<16x128xf32>
    %cst_12 = arith.constant 3.42353964 : f32
    %31 = vector.broadcast %cst_12 : f32 to vector<16x128xf32>
    %32 = arith.addf %24, %31 : vector<16x128xf32>
    %33 = arith.select %30, %32, %24 : vector<16x128xi1>, vector<16x128xf32>
    %34 = arith.select %26, %28, %33 : vector<16x128xi1>, vector<16x128xf32>
    %35 = math.absf %34 : vector<16x128xf32>
    %cst_13 = arith.constant -3.14159274 : f32
    %36 = vector.broadcast %cst_13 : f32 to vector<16x128xf32>
    %cst_14 = arith.constant -1.49779868 : f32
    %37 = vector.broadcast %cst_14 : f32 to vector<16x128xf32>
    %38 = arith.subf %22, %37 : vector<16x128xf32>
    %cst_15 = arith.constant 1.71176982 : f32
    %39 = vector.broadcast %cst_15 : f32 to vector<16x128xf32>
    %40 = arith.cmpf oge, %38, %39 : vector<16x128xf32>
    %cst_16 = arith.constant 3.42353964 : f32
    %41 = vector.broadcast %cst_16 : f32 to vector<16x128xf32>
    %42 = arith.subf %38, %41 : vector<16x128xf32>
    %cst_17 = arith.constant -1.71176982 : f32
    %43 = vector.broadcast %cst_17 : f32 to vector<16x128xf32>
    %44 = arith.cmpf olt, %38, %43 : vector<16x128xf32>
    %cst_18 = arith.constant 3.42353964 : f32
    %45 = vector.broadcast %cst_18 : f32 to vector<16x128xf32>
    %46 = arith.addf %38, %45 : vector<16x128xf32>
    %47 = arith.select %44, %46, %38 : vector<16x128xi1>, vector<16x128xf32>
    %48 = arith.select %40, %42, %47 : vector<16x128xi1>, vector<16x128xf32>
    %49 = math.absf %48 : vector<16x128xf32>
    %50 = arith.cmpf olt, %49, %35 : vector<16x128xf32>
    %51 = arith.select %50, %49, %35 : vector<16x128xi1>, vector<16x128xf32>
    %cst_19 = arith.constant -2.74889374 : f32
    %52 = vector.broadcast %cst_19 : f32 to vector<16x128xf32>
    %53 = arith.select %50, %52, %36 : vector<16x128xi1>, vector<16x128xf32>
    %cst_20 = arith.constant -1.28382754 : f32
    %54 = vector.broadcast %cst_20 : f32 to vector<16x128xf32>
    %55 = arith.subf %22, %54 : vector<16x128xf32>
    %cst_21 = arith.constant 1.71176982 : f32
    %56 = vector.broadcast %cst_21 : f32 to vector<16x128xf32>
    %57 = arith.cmpf oge, %55, %56 : vector<16x128xf32>
    %cst_22 = arith.constant 3.42353964 : f32
    %58 = vector.broadcast %cst_22 : f32 to vector<16x128xf32>
    %59 = arith.subf %55, %58 : vector<16x128xf32>
    %cst_23 = arith.constant -1.71176982 : f32
    %60 = vector.broadcast %cst_23 : f32 to vector<16x128xf32>
    %61 = arith.cmpf olt, %55, %60 : vector<16x128xf32>
    %cst_24 = arith.constant 3.42353964 : f32
    %62 = vector.broadcast %cst_24 : f32 to vector<16x128xf32>
    %63 = arith.addf %55, %62 : vector<16x128xf32>
    %64 = arith.select %61, %63, %55 : vector<16x128xi1>, vector<16x128xf32>
    %65 = arith.select %57, %59, %64 : vector<16x128xi1>, vector<16x128xf32>
    %66 = math.absf %65 : vector<16x128xf32>
    %67 = arith.cmpf olt, %66, %51 : vector<16x128xf32>
    %68 = arith.select %67, %66, %51 : vector<16x128xi1>, vector<16x128xf32>
    %cst_25 = arith.constant -2.35619473 : f32
    %69 = vector.broadcast %cst_25 : f32 to vector<16x128xf32>
    %70 = arith.select %67, %69, %53 : vector<16x128xi1>, vector<16x128xf32>
    %cst_26 = arith.constant -1.06985617 : f32
    %71 = vector.broadcast %cst_26 : f32 to vector<16x128xf32>
    %72 = arith.subf %22, %71 : vector<16x128xf32>
    %cst_27 = arith.constant 1.71176982 : f32
    %73 = vector.broadcast %cst_27 : f32 to vector<16x128xf32>
    %74 = arith.cmpf oge, %72, %73 : vector<16x128xf32>
    %cst_28 = arith.constant 3.42353964 : f32
    %75 = vector.broadcast %cst_28 : f32 to vector<16x128xf32>
    %76 = arith.subf %72, %75 : vector<16x128xf32>
    %cst_29 = arith.constant -1.71176982 : f32
    %77 = vector.broadcast %cst_29 : f32 to vector<16x128xf32>
    %78 = arith.cmpf olt, %72, %77 : vector<16x128xf32>
    %cst_30 = arith.constant 3.42353964 : f32
    %79 = vector.broadcast %cst_30 : f32 to vector<16x128xf32>
    %80 = arith.addf %72, %79 : vector<16x128xf32>
    %81 = arith.select %78, %80, %72 : vector<16x128xi1>, vector<16x128xf32>
    %82 = arith.select %74, %76, %81 : vector<16x128xi1>, vector<16x128xf32>
    %83 = math.absf %82 : vector<16x128xf32>
    %84 = arith.cmpf olt, %83, %68 : vector<16x128xf32>
    %85 = arith.select %84, %83, %68 : vector<16x128xi1>, vector<16x128xf32>
    %cst_31 = arith.constant -1.96349549 : f32
    %86 = vector.broadcast %cst_31 : f32 to vector<16x128xf32>
    %87 = arith.select %84, %86, %70 : vector<16x128xi1>, vector<16x128xf32>
    %cst_32 = arith.constant -0.855884909 : f32
    %88 = vector.broadcast %cst_32 : f32 to vector<16x128xf32>
    %89 = arith.subf %22, %88 : vector<16x128xf32>
    %cst_33 = arith.constant 1.71176982 : f32
    %90 = vector.broadcast %cst_33 : f32 to vector<16x128xf32>
    %91 = arith.cmpf oge, %89, %90 : vector<16x128xf32>
    %cst_34 = arith.constant 3.42353964 : f32
    %92 = vector.broadcast %cst_34 : f32 to vector<16x128xf32>
    %93 = arith.subf %89, %92 : vector<16x128xf32>
    %cst_35 = arith.constant -1.71176982 : f32
    %94 = vector.broadcast %cst_35 : f32 to vector<16x128xf32>
    %95 = arith.cmpf olt, %89, %94 : vector<16x128xf32>
    %cst_36 = arith.constant 3.42353964 : f32
    %96 = vector.broadcast %cst_36 : f32 to vector<16x128xf32>
    %97 = arith.addf %89, %96 : vector<16x128xf32>
    %98 = arith.select %95, %97, %89 : vector<16x128xi1>, vector<16x128xf32>
    %99 = arith.select %91, %93, %98 : vector<16x128xi1>, vector<16x128xf32>
    %100 = math.absf %99 : vector<16x128xf32>
    %101 = arith.cmpf olt, %100, %85 : vector<16x128xf32>
    %102 = arith.select %101, %100, %85 : vector<16x128xi1>, vector<16x128xf32>
    %cst_37 = arith.constant -1.57079625 : f32
    %103 = vector.broadcast %cst_37 : f32 to vector<16x128xf32>
    %104 = arith.select %101, %103, %87 : vector<16x128xi1>, vector<16x128xf32>
    %cst_38 = arith.constant -0.641913772 : f32
    %105 = vector.broadcast %cst_38 : f32 to vector<16x128xf32>
    %106 = arith.subf %22, %105 : vector<16x128xf32>
    %cst_39 = arith.constant 1.71176982 : f32
    %107 = vector.broadcast %cst_39 : f32 to vector<16x128xf32>
    %108 = arith.cmpf oge, %106, %107 : vector<16x128xf32>
    %cst_40 = arith.constant 3.42353964 : f32
    %109 = vector.broadcast %cst_40 : f32 to vector<16x128xf32>
    %110 = arith.subf %106, %109 : vector<16x128xf32>
    %cst_41 = arith.constant -1.71176982 : f32
    %111 = vector.broadcast %cst_41 : f32 to vector<16x128xf32>
    %112 = arith.cmpf olt, %106, %111 : vector<16x128xf32>
    %cst_42 = arith.constant 3.42353964 : f32
    %113 = vector.broadcast %cst_42 : f32 to vector<16x128xf32>
    %114 = arith.addf %106, %113 : vector<16x128xf32>
    %115 = arith.select %112, %114, %106 : vector<16x128xi1>, vector<16x128xf32>
    %116 = arith.select %108, %110, %115 : vector<16x128xi1>, vector<16x128xf32>
    %117 = math.absf %116 : vector<16x128xf32>
    %118 = arith.cmpf olt, %117, %102 : vector<16x128xf32>
    %119 = arith.select %118, %117, %102 : vector<16x128xi1>, vector<16x128xf32>
    %cst_43 = arith.constant -1.17809737 : f32
    %120 = vector.broadcast %cst_43 : f32 to vector<16x128xf32>
    %121 = arith.select %118, %120, %104 : vector<16x128xi1>, vector<16x128xf32>
    %cst_44 = arith.constant -0.427942514 : f32
    %122 = vector.broadcast %cst_44 : f32 to vector<16x128xf32>
    %123 = arith.subf %22, %122 : vector<16x128xf32>
    %cst_45 = arith.constant 1.71176982 : f32
    %124 = vector.broadcast %cst_45 : f32 to vector<16x128xf32>
    %125 = arith.cmpf oge, %123, %124 : vector<16x128xf32>
    %cst_46 = arith.constant 3.42353964 : f32
    %126 = vector.broadcast %cst_46 : f32 to vector<16x128xf32>
    %127 = arith.subf %123, %126 : vector<16x128xf32>
    %cst_47 = arith.constant -1.71176982 : f32
    %128 = vector.broadcast %cst_47 : f32 to vector<16x128xf32>
    %129 = arith.cmpf olt, %123, %128 : vector<16x128xf32>
    %cst_48 = arith.constant 3.42353964 : f32
    %130 = vector.broadcast %cst_48 : f32 to vector<16x128xf32>
    %131 = arith.addf %123, %130 : vector<16x128xf32>
    %132 = arith.select %129, %131, %123 : vector<16x128xi1>, vector<16x128xf32>
    %133 = arith.select %125, %127, %132 : vector<16x128xi1>, vector<16x128xf32>
    %134 = math.absf %133 : vector<16x128xf32>
    %135 = arith.cmpf olt, %134, %119 : vector<16x128xf32>
    %136 = arith.select %135, %134, %119 : vector<16x128xi1>, vector<16x128xf32>
    %cst_49 = arith.constant -0.785398245 : f32
    %137 = vector.broadcast %cst_49 : f32 to vector<16x128xf32>
    %138 = arith.select %135, %137, %121 : vector<16x128xi1>, vector<16x128xf32>
    %cst_50 = arith.constant -0.213971227 : f32
    %139 = vector.broadcast %cst_50 : f32 to vector<16x128xf32>
    %140 = arith.subf %22, %139 : vector<16x128xf32>
    %cst_51 = arith.constant 1.71176982 : f32
    %141 = vector.broadcast %cst_51 : f32 to vector<16x128xf32>
    %142 = arith.cmpf oge, %140, %141 : vector<16x128xf32>
    %cst_52 = arith.constant 3.42353964 : f32
    %143 = vector.broadcast %cst_52 : f32 to vector<16x128xf32>
    %144 = arith.subf %140, %143 : vector<16x128xf32>
    %cst_53 = arith.constant -1.71176982 : f32
    %145 = vector.broadcast %cst_53 : f32 to vector<16x128xf32>
    %146 = arith.cmpf olt, %140, %145 : vector<16x128xf32>
    %cst_54 = arith.constant 3.42353964 : f32
    %147 = vector.broadcast %cst_54 : f32 to vector<16x128xf32>
    %148 = arith.addf %140, %147 : vector<16x128xf32>
    %149 = arith.select %146, %148, %140 : vector<16x128xi1>, vector<16x128xf32>
    %150 = arith.select %142, %144, %149 : vector<16x128xi1>, vector<16x128xf32>
    %151 = math.absf %150 : vector<16x128xf32>
    %152 = arith.cmpf olt, %151, %136 : vector<16x128xf32>
    %153 = arith.select %152, %151, %136 : vector<16x128xi1>, vector<16x128xf32>
    %cst_55 = arith.constant -0.392699063 : f32
    %154 = vector.broadcast %cst_55 : f32 to vector<16x128xf32>
    %155 = arith.select %152, %154, %138 : vector<16x128xi1>, vector<16x128xf32>
    %cst_56 = arith.constant 0.000000e+00 : f32
    %156 = vector.broadcast %cst_56 : f32 to vector<16x128xf32>
    %157 = arith.subf %22, %156 : vector<16x128xf32>
    %cst_57 = arith.constant 1.71176982 : f32
    %158 = vector.broadcast %cst_57 : f32 to vector<16x128xf32>
    %159 = arith.cmpf oge, %157, %158 : vector<16x128xf32>
    %cst_58 = arith.constant 3.42353964 : f32
    %160 = vector.broadcast %cst_58 : f32 to vector<16x128xf32>
    %161 = arith.subf %157, %160 : vector<16x128xf32>
    %cst_59 = arith.constant -1.71176982 : f32
    %162 = vector.broadcast %cst_59 : f32 to vector<16x128xf32>
    %163 = arith.cmpf olt, %157, %162 : vector<16x128xf32>
    %cst_60 = arith.constant 3.42353964 : f32
    %164 = vector.broadcast %cst_60 : f32 to vector<16x128xf32>
    %165 = arith.addf %157, %164 : vector<16x128xf32>
    %166 = arith.select %163, %165, %157 : vector<16x128xi1>, vector<16x128xf32>
    %167 = arith.select %159, %161, %166 : vector<16x128xi1>, vector<16x128xf32>
    %168 = math.absf %167 : vector<16x128xf32>
    %169 = arith.cmpf olt, %168, %153 : vector<16x128xf32>
    %170 = arith.select %169, %168, %153 : vector<16x128xi1>, vector<16x128xf32>
    %cst_61 = arith.constant 0.000000e+00 : f32
    %171 = vector.broadcast %cst_61 : f32 to vector<16x128xf32>
    %172 = arith.select %169, %171, %155 : vector<16x128xi1>, vector<16x128xf32>
    %cst_62 = arith.constant 0.213971227 : f32
    %173 = vector.broadcast %cst_62 : f32 to vector<16x128xf32>
    %174 = arith.subf %22, %173 : vector<16x128xf32>
    %cst_63 = arith.constant 1.71176982 : f32
    %175 = vector.broadcast %cst_63 : f32 to vector<16x128xf32>
    %176 = arith.cmpf oge, %174, %175 : vector<16x128xf32>
    %cst_64 = arith.constant 3.42353964 : f32
    %177 = vector.broadcast %cst_64 : f32 to vector<16x128xf32>
    %178 = arith.subf %174, %177 : vector<16x128xf32>
    %cst_65 = arith.constant -1.71176982 : f32
    %179 = vector.broadcast %cst_65 : f32 to vector<16x128xf32>
    %180 = arith.cmpf olt, %174, %179 : vector<16x128xf32>
    %cst_66 = arith.constant 3.42353964 : f32
    %181 = vector.broadcast %cst_66 : f32 to vector<16x128xf32>
    %182 = arith.addf %174, %181 : vector<16x128xf32>
    %183 = arith.select %180, %182, %174 : vector<16x128xi1>, vector<16x128xf32>
    %184 = arith.select %176, %178, %183 : vector<16x128xi1>, vector<16x128xf32>
    %185 = math.absf %184 : vector<16x128xf32>
    %186 = arith.cmpf olt, %185, %170 : vector<16x128xf32>
    %187 = arith.select %186, %185, %170 : vector<16x128xi1>, vector<16x128xf32>
    %cst_67 = arith.constant 0.392699063 : f32
    %188 = vector.broadcast %cst_67 : f32 to vector<16x128xf32>
    %189 = arith.select %186, %188, %172 : vector<16x128xi1>, vector<16x128xf32>
    %cst_68 = arith.constant 0.427942514 : f32
    %190 = vector.broadcast %cst_68 : f32 to vector<16x128xf32>
    %191 = arith.subf %22, %190 : vector<16x128xf32>
    %cst_69 = arith.constant 1.71176982 : f32
    %192 = vector.broadcast %cst_69 : f32 to vector<16x128xf32>
    %193 = arith.cmpf oge, %191, %192 : vector<16x128xf32>
    %cst_70 = arith.constant 3.42353964 : f32
    %194 = vector.broadcast %cst_70 : f32 to vector<16x128xf32>
    %195 = arith.subf %191, %194 : vector<16x128xf32>
    %cst_71 = arith.constant -1.71176982 : f32
    %196 = vector.broadcast %cst_71 : f32 to vector<16x128xf32>
    %197 = arith.cmpf olt, %191, %196 : vector<16x128xf32>
    %cst_72 = arith.constant 3.42353964 : f32
    %198 = vector.broadcast %cst_72 : f32 to vector<16x128xf32>
    %199 = arith.addf %191, %198 : vector<16x128xf32>
    %200 = arith.select %197, %199, %191 : vector<16x128xi1>, vector<16x128xf32>
    %201 = arith.select %193, %195, %200 : vector<16x128xi1>, vector<16x128xf32>
    %202 = math.absf %201 : vector<16x128xf32>
    %203 = arith.cmpf olt, %202, %187 : vector<16x128xf32>
    %204 = arith.select %203, %202, %187 : vector<16x128xi1>, vector<16x128xf32>
    %cst_73 = arith.constant 0.785398245 : f32
    %205 = vector.broadcast %cst_73 : f32 to vector<16x128xf32>
    %206 = arith.select %203, %205, %189 : vector<16x128xi1>, vector<16x128xf32>
    %cst_74 = arith.constant 0.641913712 : f32
    %207 = vector.broadcast %cst_74 : f32 to vector<16x128xf32>
    %208 = arith.subf %22, %207 : vector<16x128xf32>
    %cst_75 = arith.constant 1.71176982 : f32
    %209 = vector.broadcast %cst_75 : f32 to vector<16x128xf32>
    %210 = arith.cmpf oge, %208, %209 : vector<16x128xf32>
    %cst_76 = arith.constant 3.42353964 : f32
    %211 = vector.broadcast %cst_76 : f32 to vector<16x128xf32>
    %212 = arith.subf %208, %211 : vector<16x128xf32>
    %cst_77 = arith.constant -1.71176982 : f32
    %213 = vector.broadcast %cst_77 : f32 to vector<16x128xf32>
    %214 = arith.cmpf olt, %208, %213 : vector<16x128xf32>
    %cst_78 = arith.constant 3.42353964 : f32
    %215 = vector.broadcast %cst_78 : f32 to vector<16x128xf32>
    %216 = arith.addf %208, %215 : vector<16x128xf32>
    %217 = arith.select %214, %216, %208 : vector<16x128xi1>, vector<16x128xf32>
    %218 = arith.select %210, %212, %217 : vector<16x128xi1>, vector<16x128xf32>
    %219 = math.absf %218 : vector<16x128xf32>
    %220 = arith.cmpf olt, %219, %204 : vector<16x128xf32>
    %221 = arith.select %220, %219, %204 : vector<16x128xi1>, vector<16x128xf32>
    %cst_79 = arith.constant 1.17809725 : f32
    %222 = vector.broadcast %cst_79 : f32 to vector<16x128xf32>
    %223 = arith.select %220, %222, %206 : vector<16x128xi1>, vector<16x128xf32>
    %cst_80 = arith.constant 0.855884969 : f32
    %224 = vector.broadcast %cst_80 : f32 to vector<16x128xf32>
    %225 = arith.subf %22, %224 : vector<16x128xf32>
    %cst_81 = arith.constant 1.71176982 : f32
    %226 = vector.broadcast %cst_81 : f32 to vector<16x128xf32>
    %227 = arith.cmpf oge, %225, %226 : vector<16x128xf32>
    %cst_82 = arith.constant 3.42353964 : f32
    %228 = vector.broadcast %cst_82 : f32 to vector<16x128xf32>
    %229 = arith.subf %225, %228 : vector<16x128xf32>
    %cst_83 = arith.constant -1.71176982 : f32
    %230 = vector.broadcast %cst_83 : f32 to vector<16x128xf32>
    %231 = arith.cmpf olt, %225, %230 : vector<16x128xf32>
    %cst_84 = arith.constant 3.42353964 : f32
    %232 = vector.broadcast %cst_84 : f32 to vector<16x128xf32>
    %233 = arith.addf %225, %232 : vector<16x128xf32>
    %234 = arith.select %231, %233, %225 : vector<16x128xi1>, vector<16x128xf32>
    %235 = arith.select %227, %229, %234 : vector<16x128xi1>, vector<16x128xf32>
    %236 = math.absf %235 : vector<16x128xf32>
    %237 = arith.cmpf olt, %236, %221 : vector<16x128xf32>
    %238 = arith.select %237, %236, %221 : vector<16x128xi1>, vector<16x128xf32>
    %cst_85 = arith.constant 1.57079637 : f32
    %239 = vector.broadcast %cst_85 : f32 to vector<16x128xf32>
    %240 = arith.select %237, %239, %223 : vector<16x128xi1>, vector<16x128xf32>
    %cst_86 = arith.constant 1.06985617 : f32
    %241 = vector.broadcast %cst_86 : f32 to vector<16x128xf32>
    %242 = arith.subf %22, %241 : vector<16x128xf32>
    %cst_87 = arith.constant 1.71176982 : f32
    %243 = vector.broadcast %cst_87 : f32 to vector<16x128xf32>
    %244 = arith.cmpf oge, %242, %243 : vector<16x128xf32>
    %cst_88 = arith.constant 3.42353964 : f32
    %245 = vector.broadcast %cst_88 : f32 to vector<16x128xf32>
    %246 = arith.subf %242, %245 : vector<16x128xf32>
    %cst_89 = arith.constant -1.71176982 : f32
    %247 = vector.broadcast %cst_89 : f32 to vector<16x128xf32>
    %248 = arith.cmpf olt, %242, %247 : vector<16x128xf32>
    %cst_90 = arith.constant 3.42353964 : f32
    %249 = vector.broadcast %cst_90 : f32 to vector<16x128xf32>
    %250 = arith.addf %242, %249 : vector<16x128xf32>
    %251 = arith.select %248, %250, %242 : vector<16x128xi1>, vector<16x128xf32>
    %252 = arith.select %244, %246, %251 : vector<16x128xi1>, vector<16x128xf32>
    %253 = math.absf %252 : vector<16x128xf32>
    %254 = arith.cmpf olt, %253, %238 : vector<16x128xf32>
    %255 = arith.select %254, %253, %238 : vector<16x128xi1>, vector<16x128xf32>
    %cst_91 = arith.constant 1.96349549 : f32
    %256 = vector.broadcast %cst_91 : f32 to vector<16x128xf32>
    %257 = arith.select %254, %256, %240 : vector<16x128xi1>, vector<16x128xf32>
    %cst_92 = arith.constant 1.28382742 : f32
    %258 = vector.broadcast %cst_92 : f32 to vector<16x128xf32>
    %259 = arith.subf %22, %258 : vector<16x128xf32>
    %cst_93 = arith.constant 1.71176982 : f32
    %260 = vector.broadcast %cst_93 : f32 to vector<16x128xf32>
    %261 = arith.cmpf oge, %259, %260 : vector<16x128xf32>
    %cst_94 = arith.constant 3.42353964 : f32
    %262 = vector.broadcast %cst_94 : f32 to vector<16x128xf32>
    %263 = arith.subf %259, %262 : vector<16x128xf32>
    %cst_95 = arith.constant -1.71176982 : f32
    %264 = vector.broadcast %cst_95 : f32 to vector<16x128xf32>
    %265 = arith.cmpf olt, %259, %264 : vector<16x128xf32>
    %cst_96 = arith.constant 3.42353964 : f32
    %266 = vector.broadcast %cst_96 : f32 to vector<16x128xf32>
    %267 = arith.addf %259, %266 : vector<16x128xf32>
    %268 = arith.select %265, %267, %259 : vector<16x128xi1>, vector<16x128xf32>
    %269 = arith.select %261, %263, %268 : vector<16x128xi1>, vector<16x128xf32>
    %270 = math.absf %269 : vector<16x128xf32>
    %271 = arith.cmpf olt, %270, %255 : vector<16x128xf32>
    %272 = arith.select %271, %270, %255 : vector<16x128xi1>, vector<16x128xf32>
    %cst_97 = arith.constant 2.3561945 : f32
    %273 = vector.broadcast %cst_97 : f32 to vector<16x128xf32>
    %274 = arith.select %271, %273, %257 : vector<16x128xi1>, vector<16x128xf32>
    %cst_98 = arith.constant 1.49779868 : f32
    %275 = vector.broadcast %cst_98 : f32 to vector<16x128xf32>
    %276 = arith.subf %22, %275 : vector<16x128xf32>
    %cst_99 = arith.constant 1.71176982 : f32
    %277 = vector.broadcast %cst_99 : f32 to vector<16x128xf32>
    %278 = arith.cmpf oge, %276, %277 : vector<16x128xf32>
    %cst_100 = arith.constant 3.42353964 : f32
    %279 = vector.broadcast %cst_100 : f32 to vector<16x128xf32>
    %280 = arith.subf %276, %279 : vector<16x128xf32>
    %cst_101 = arith.constant -1.71176982 : f32
    %281 = vector.broadcast %cst_101 : f32 to vector<16x128xf32>
    %282 = arith.cmpf olt, %276, %281 : vector<16x128xf32>
    %cst_102 = arith.constant 3.42353964 : f32
    %283 = vector.broadcast %cst_102 : f32 to vector<16x128xf32>
    %284 = arith.addf %276, %283 : vector<16x128xf32>
    %285 = arith.select %282, %284, %276 : vector<16x128xi1>, vector<16x128xf32>
    %286 = arith.select %278, %280, %285 : vector<16x128xi1>, vector<16x128xf32>
    %287 = math.absf %286 : vector<16x128xf32>
    %288 = arith.cmpf olt, %287, %272 : vector<16x128xf32>
    %cst_103 = arith.constant 2.74889374 : f32
    %289 = vector.broadcast %cst_103 : f32 to vector<16x128xf32>
    %290 = arith.select %288, %289, %274 : vector<16x128xi1>, vector<16x128xf32>
    %c0_104 = arith.constant 0 : index
    %c0_105 = arith.constant 0 : index
    %291 = vector.load %arg2[%c0_104, %c0_105] : memref<16x128xf32, #tpu.memory_space<vmem>>, vector<16x128xf32>
    tpu.vector_store %arg2[%c0_104, %c0_105], %290 {strides = array<i32>} : memref<16x128xf32, #tpu.memory_space<vmem>>, vector<16x128xf32>,
    return
  }
  func.func @transform_0(%arg0: i32) -> (i32, i32) {
    %c0_i32 = arith.constant 0 : i32
    %c0_i32_0 = arith.constant 0 : i32
    return %arg0, %c0_i32 : i32, i32
  }
  func.func @transform_1(%arg0: i32) -> (i32, i32) {
    %c0_i32 = arith.constant 0 : i32
    %c0_i32_0 = arith.constant 0 : i32
    return %arg0, %c0_i32 : i32, i32
  }
}

</mosaic_0001>

<bundles_post_ra>
// kernel: tpu_custom_call.1
= control target key start
LH: loop header
LB: loop body
LE: loop exit
PB: predicated region body
PF: predicated region fallthrough
CT: control target
= control target key end

     0   :  { %6 = vsyncpa [#allocation3], 0  ;;  %s813_s0 = inlined_call_operand.hbm [shape: f32[16,128], index: 0, kind: input, shape index: {}]   ;;  %s814_s1 = inlined_call_operand.hbm [shape: f32[16,128], index: 1, kind: output, shape index: {}]  }
   0x1   :  { %7 = vsyncpa [#allocation4], 0  ;;  %s543_s6 = smov [#allocation2]   ;;  %s495_s10 = scalar_lea.hbm %s813_s0, 256 }
   0x2   :  { %s13_s7 = sshll.u32 %s543_s6, 4  ;;  %p496_p0 = scmp.ne.s32.totalorder %s813_s0, %s495_s10  ;;  %s14_s7 = int_to_ptr.vmem [resolvable:$true] %s13_s7 }
   0x3   :  { %p499_p1 = scmp.lt.u32.totalorder %s495_s10, %s813_s0 }
   0x5   :  { %p501_p2 = pnand %p499_p1, %p496_p0 }
   0x7   :  { %504 = shalt.err (!%p501_p2)
}
   0x8   :  { %s505_s15 = scalar_lea.vmem %s14_s7, 256  ;;  %p510_p4 = scmp.lt.s32.totalorder %s14_s7, %s14_s7 }
   0x9   :  { %p506_p3 = scmp.ne.s32.totalorder %s14_s7, %s505_s15  ;;  %p511_p5 = scmp.lt.s32.totalorder %s505_s15, %s505_s15 }
   0xb   :  { %p512_p6 = por %p511_p5, %p510_p4 }
   0xd   :  { %p513_p7 = pnand %p512_p6, %p506_p3 }
   0xf   :  { %516 = shalt.err (!%p513_p7)
}
  0x10   :  { %s544_s16 = smov 128   ;;  %s545_s17 = smov 8  }
  0x11   :  { %19 = dma.hbm_to_vmem [thread:$0]  %s813_s0, 256, %s14_s7, [#allocation3], %s544_s16, %s544_s16, %s545_s17  }
  0x12   :  { %539 = dma.done.wait [#allocation3], 256  }
  0x13   :  { %540 = vsyncadd [#allocation3], 4294967040  ;;  %v23_v0 = vld [vmem:[#allocation2] sm:$0xff]  ;;  %v24_v1 = vld [vmem:[#allocation2 + $0x8] sm:$0xff]  ;;  %s547_s0 = smov [#allocation5]  }
  0x14   :  { %v27_v2 = vadd.f32 3.1415927, %v23_v0  ;;  %v28_v3 = vadd.f32 3.1415927, %v24_v1  ;;  %v546_v0 = vmov -3.1415927  }
  0x15   :  { %s414_s20 = sshll.u32 %s547_s0, 4  ;;  %s415_s20 = int_to_ptr.vmem [resolvable:$true] %s414_s20 }
  0x16   :  { %v29_v4 = vand.u32 2147483647, %v27_v2  ;;  %v40_v5 = vand.u32 2147483647, %v28_v3  ;;  %v38_v14 = vand.u32 2147483648, %v27_v2  ;;  %v49_v15 = vand.u32 2147483648, %v28_v3  ;;  %p522_p9 = scmp.lt.s32.totalorder %s415_s20, %s415_s20 }
  0x17   :  { %s517_s21 = scalar_lea.vmem %s415_s20, 256 }
  0x18   :  { %v31_v6 = vmul.f32 0.15915494, %v29_v4  ;;  %v42_v7 = vmul.f32 0.15915494, %v40_v5  ;;  %p518_p8 = scmp.ne.s32.totalorder %s415_s20, %s517_s21  ;;  %p523_p10 = scmp.lt.s32.totalorder %s517_s21, %s517_s21 }
  0x1a   :  { %v32_v8 = vfloor.f32 %v31_v6  ;;  %v43_v9 = vfloor.f32 %v42_v7  ;;  %p524_p11 = por %p523_p10, %p522_p9 }
  0x1c   :  { %v33_v10 = vmul.f32 6.2831855, %v32_v8  ;;  %v44_v11 = vmul.f32 6.2831855, %v43_v9  ;;  %p525_p12 = pnand %p524_p11, %p518_p8 }
  0x1e   :  { %v34_v12 = vsub.f32 %v29_v4, %v33_v10  ;;  %v45_v13 = vsub.f32 %v40_v5, %v44_v11 }
  0x20   :  { %vm35_vm0 = vcmp.eq.f32.partialorder %v34_v12, 6.2831855  ;;  %vm46_vm1 = vcmp.eq.f32.partialorder %v45_v13, 6.2831855 }
  0x21   :  { %v36_v16 = vsel %vm35_vm0, 0.0, %v34_v12  ;;  %v47_v17 = vsel %vm46_vm1, 0.0, %v45_v13 }
  0x22   :  { %v37_v18 = vand.u32 2147483647, %v36_v16  ;;  %v48_v19 = vand.u32 2147483647, %v47_v17 }
  0x24   :  { %v39_v20 = vor.u32 %v38_v14, %v37_v18  ;;  %v50_v21 = vor.u32 %v49_v15, %v48_v19 }
  0x26   :  { %vm51_vm2 = vcmp.ne.f32.partialorder %v39_v20, 0.0  ;;  %vm52_vm3 = vcmp.ne.f32.partialorder %v50_v21, 0.0  ;;  %vm53_vm4 = vcmp.lt.f32.partialorder %v39_v20, 0.0  ;;  %vm54_vm5 = vcmp.lt.f32.partialorder %v50_v21, 0.0 }
  0x27   :  { %vm55_vm6 = vmand %vm53_vm4, %vm51_vm2  ;;  %v57_v22 = vadd.f32 6.2831855, %v39_v20  ;;  %v58_v23 = vadd.f32 6.2831855, %v50_v21 }
  0x28   :  { %vm56_vm7 = vmand %vm54_vm5, %vm52_vm3 }
  0x29   :  { %v59_v24 = vsel %vm55_vm6, %v57_v22, %v39_v20  ;;  %v60_v25 = vsel %vm56_vm7, %v58_v23, %v50_v21 }
  0x2a   :  { %v426_v26 = vadd.f32 -3.1415927, %v59_v24  ;;  %v427_v27 = vadd.f32 -3.1415927, %v60_v25 }
  0x2c   :  { %v573_v28 = vmul.f32 0.5448733, %v426_v26  ;;  %v575_v29 = vmul.f32 0.5448733, %v427_v27 }
  0x2e   :  { %v428_v30 = vadd.f32 1.7117699, %v573_v28  ;;  %v429_v31 = vadd.f32 1.7117699, %v575_v29  ;;  %v432_v32 = vadd.f32 1.4977987, %v573_v28 }
  0x2f   :  { %v433_v33 = vadd.f32 1.4977987, %v575_v29  ;;  %v436_v34 = vadd.f32 1.2838275, %v573_v28  ;;  %v437_v35 = vadd.f32 1.2838275, %v575_v29 }
  0x30   :  { %vm67_vm8 = vcmp.ge.f32.partialorder %v428_v30, 1.7117698  ;;  %vm68_vm9 = vcmp.ge.f32.partialorder %v429_v31, 1.7117698  ;;  %v430_v36 = vadd.f32 -3.4235396, %v428_v30 }
  0x31   :  { %v431_v37 = vadd.f32 -3.4235396, %v429_v31  ;;  %vm71_vm10 = vcmp.lt.f32.partialorder %v428_v30, -1.7117698  ;;  %vm72_vm11 = vcmp.lt.f32.partialorder %v429_v31, -1.7117698 }
  0x32   :  { %v73_v38 = vadd.f32 3.4235396, %v428_v30  ;;  %v74_v39 = vadd.f32 3.4235396, %v429_v31  ;;  %vm83_vm12 = vcmp.ge.f32.partialorder %v432_v32, 1.7117698 }
  0x33   :  { %vm84_vm13 = vcmp.ge.f32.partialorder %v433_v33, 1.7117698  ;;  %v434_v40 = vadd.f32 -3.4235396, %v432_v32  ;;  %v435_v41 = vadd.f32 -3.4235396, %v433_v33 }
  0x34   :  { %v75_v42 = vsel %vm71_vm10, %v73_v38, %v428_v30  ;;  %v76_v43 = vsel %vm72_vm11, %v74_v39, %v429_v31  ;;  %vm87_vm14 = vcmp.lt.f32.partialorder %v432_v32, -1.7117698  ;;  %vm88_vm15 = vcmp.lt.f32.partialorder %v433_v33, -1.7117698 }
  0x35   :  { %v77_v44 = vsel %vm67_vm8, %v430_v36, %v75_v42  ;;  %v78_v45 = vsel %vm68_vm9, %v431_v37, %v76_v43  ;;  %v89_v46 = vadd.f32 3.4235396, %v432_v32  ;;  %v90_v47 = vadd.f32 3.4235396, %v433_v33 }
  0x36   :  { %v79_v48 = vand.u32 2147483647, %v77_v44  ;;  %v80_v49 = vand.u32 2147483647, %v78_v45  ;;  %vm105_vm0 = vcmp.ge.f32.partialorder %v436_v34, 1.7117698 }
  0x37   :  { %v91_v50 = vsel %vm87_vm14, %v89_v46, %v432_v32  ;;  %v92_v51 = vsel %vm88_vm15, %v90_v47, %v433_v33  ;;  %v438_v52 = vadd.f32 -3.4235396, %v436_v34  ;;  %v439_v55 = vadd.f32 -3.4235396, %v437_v35 }
  0x38   :  { %v93_v53 = vsel %vm83_vm12, %v434_v40, %v91_v50  ;;  %v94_v54 = vsel %vm84_vm13, %v435_v41, %v92_v51  ;;  %vm109_vm1 = vcmp.lt.f32.partialorder %v436_v34, -1.7117698  ;;  %vm110_vm2 = vcmp.lt.f32.partialorder %v437_v35, -1.7117698 }
  0x39   :  { %v95_v56 = vand.u32 2147483647, %v93_v53  ;;  %v96_v57 = vand.u32 2147483647, %v94_v54  ;;  %v111_v58 = vadd.f32 3.4235396, %v436_v34 }
  0x3a   :  { %v112_v59 = vadd.f32 3.4235396, %v437_v35  ;;  %v440_v60 = vadd.f32 1.0698562, %v573_v28  ;;  %vm106_vm5 = vcmp.ge.f32.partialorder %v437_v35, 1.7117698 }
  0x3b   :  { %vm97_vm3 = vcmp.lt.f32.partialorder %v95_v56, %v79_v48  ;;  %vm98_vm4 = vcmp.lt.f32.partialorder %v96_v57, %v80_v49  ;;  %v441_v61 = vadd.f32 1.0698562, %v575_v29  ;;  %v444_v2 = vadd.f32 0.8558849, %v573_v28 }
  0x3c   :  { %v99_v62 = vsel %vm97_vm3, %v95_v56, %v79_v48  ;;  %v100_v63 = vsel %vm98_vm4, %v96_v57, %v80_v49  ;;  %v101_v1 = vsel %vm97_vm3, -2.7488937, %v546_v0  ;;  %v102_v3 = vsel %vm98_vm4, -2.7488937, %v546_v0 }
  0x3d   :  { %v113_v4 = vsel %vm109_vm1, %v111_v58, %v436_v34  ;;  %v114_v5 = vsel %vm110_vm2, %v112_v59, %v437_v35  ;;  %vm127_vm6 = vcmp.ge.f32.partialorder %v440_v60, 1.7117698  ;;  %v442_v8 = vadd.f32 -3.4235396, %v440_v60 }
  0x3e   :  { %v115_v6 = vsel %vm105_vm0, %v438_v52, %v113_v4  ;;  %v116_v7 = vsel %vm106_vm5, %v439_v55, %v114_v5  ;;  %v443_v9 = vadd.f32 -3.4235396, %v441_v61  ;;  %vm131_vm7 = vcmp.lt.f32.partialorder %v440_v60, -1.7117698 }
  0x3f   :  { %v117_v10 = vand.u32 2147483647, %v115_v6  ;;  %v118_v11 = vand.u32 2147483647, %v116_v7  ;;  %vm132_vm8 = vcmp.lt.f32.partialorder %v441_v61, -1.7117698 }
  0x40   :  { %v133_v12 = vadd.f32 3.4235396, %v440_v60  ;;  %v134_v13 = vadd.f32 3.4235396, %v441_v61  ;;  %vm128_vm11 = vcmp.ge.f32.partialorder %v441_v61, 1.7117698 }
  0x41   :  { %vm592_vm9 = vcmp.lt.f32.partialorder %v117_v10, %v99_v62  ;;  %vm596_vm10 = vcmp.lt.f32.partialorder %v118_v11, %v100_v63  ;;  %v445_v16 = vadd.f32 0.8558849, %v575_v29  ;;  %vm149_vm12 = vcmp.ge.f32.partialorder %v444_v2, 1.7117698 }
  0x42   :  { %v121_v17 = vsel %vm592_vm9, %v117_v10, %v99_v62  ;;  %v122_v18 = vsel %vm596_vm10, %v118_v11, %v100_v63  ;;  %v123_v19 = vsel %vm592_vm9, -2.3561947, %v101_v1  ;;  %v124_v20 = vsel %vm596_vm10, -2.3561947, %v102_v3 }
  0x43   :  { %v135_v21 = vsel %vm131_vm7, %v133_v12, %v440_v60  ;;  %v136_v22 = vsel %vm132_vm8, %v134_v13, %v441_v61  ;;  %v446_v23 = vadd.f32 -3.4235396, %v444_v2  ;;  %v447_v26 = vadd.f32 -3.4235396, %v445_v16 }
  0x44   :  { %v137_v24 = vsel %vm127_vm6, %v442_v8, %v135_v21  ;;  %v138_v25 = vsel %vm128_vm11, %v443_v9, %v136_v22  ;;  %vm153_vm13 = vcmp.lt.f32.partialorder %v444_v2, -1.7117698  ;;  %vm154_vm14 = vcmp.lt.f32.partialorder %v445_v16, -1.7117698 }
  0x45   :  { %v139_v27 = vand.u32 2147483647, %v137_v24  ;;  %v140_v30 = vand.u32 2147483647, %v138_v25  ;;  %v155_v31 = vadd.f32 3.4235396, %v444_v2 }
  0x46   :  { %v156_v32 = vadd.f32 3.4235396, %v445_v16  ;;  %v448_v33 = vadd.f32 0.6419138, %v573_v28  ;;  %vm150_vm1 = vcmp.ge.f32.partialorder %v445_v16, 1.7117698 }
  0x47   :  { %vm141_vm15 = vcmp.lt.f32.partialorder %v139_v27, %v121_v17  ;;  %vm142_vm0 = vcmp.lt.f32.partialorder %v140_v30, %v122_v18  ;;  %v449_v34 = vadd.f32 0.6419138, %v575_v29  ;;  %v452_v38 = vadd.f32 0.4279425, %v573_v28 }
  0x48   :  { %v143_v35 = vsel %vm141_vm15, %v139_v27, %v121_v17  ;;  %v144_v36 = vsel %vm142_vm0, %v140_v30, %v122_v18  ;;  %v145_v37 = vsel %vm141_vm15, -1.9634955, %v123_v19  ;;  %v146_v39 = vsel %vm142_vm0, -1.9634955, %v124_v20 }
  0x49   :  { %v157_v40 = vsel %vm153_vm13, %v155_v31, %v444_v2  ;;  %v158_v41 = vsel %vm154_vm14, %v156_v32, %v445_v16  ;;  %vm171_vm2 = vcmp.ge.f32.partialorder %v448_v33, 1.7117698  ;;  %v450_v44 = vadd.f32 -3.4235396, %v448_v33 }
  0x4a   :  { %v159_v42 = vsel %vm149_vm12, %v446_v23, %v157_v40  ;;  %v160_v43 = vsel %vm150_vm1, %v447_v26, %v158_v41  ;;  %v451_v45 = vadd.f32 -3.4235396, %v449_v34  ;;  %vm175_vm3 = vcmp.lt.f32.partialorder %v448_v33, -1.7117698 }
  0x4b   :  { %v161_v46 = vand.u32 2147483647, %v159_v42  ;;  %v162_v47 = vand.u32 2147483647, %v160_v43  ;;  %vm176_vm4 = vcmp.lt.f32.partialorder %v449_v34, -1.7117698 }
  0x4c   :  { %v177_v48 = vadd.f32 3.4235396, %v448_v33  ;;  %v178_v49 = vadd.f32 3.4235396, %v449_v34  ;;  %vm172_vm7 = vcmp.ge.f32.partialorder %v449_v34, 1.7117698 }
  0x4d   :  { %vm615_vm5 = vcmp.lt.f32.partialorder %v161_v46, %v143_v35  ;;  %vm619_vm6 = vcmp.lt.f32.partialorder %v162_v47, %v144_v36  ;;  %v453_v52 = vadd.f32 0.4279425, %v575_v29  ;;  %vm193_vm8 = vcmp.ge.f32.partialorder %v452_v38, 1.7117698 }
  0x4e   :  { %v165_v53 = vsel %vm615_vm5, %v161_v46, %v143_v35  ;;  %v166_v54 = vsel %vm619_vm6, %v162_v47, %v144_v36  ;;  %v167_v55 = vsel %vm615_vm5, -1.5707963, %v145_v37  ;;  %v168_v56 = vsel %vm619_vm6, -1.5707963, %v146_v39 }
  0x4f   :  { %v179_v57 = vsel %vm175_vm3, %v177_v48, %v448_v33  ;;  %v180_v58 = vsel %vm176_vm4, %v178_v49, %v449_v34  ;;  %v454_v59 = vadd.f32 -3.4235396, %v452_v38  ;;  %v455_v62 = vadd.f32 -3.4235396, %v453_v52 }
  0x50   :  { %v181_v60 = vsel %vm171_vm2, %v450_v44, %v179_v57  ;;  %v182_v61 = vsel %vm172_vm7, %v451_v45, %v180_v58  ;;  %vm197_vm9 = vcmp.lt.f32.partialorder %v452_v38, -1.7117698  ;;  %vm198_vm10 = vcmp.lt.f32.partialorder %v453_v52, -1.7117698 }
  0x51   :  { %v183_v63 = vand.u32 2147483647, %v181_v60  ;;  %v184_v0 = vand.u32 2147483647, %v182_v61  ;;  %v199_v1 = vadd.f32 3.4235396, %v452_v38 }
  0x52   :  { %v200_v2 = vadd.f32 3.4235396, %v453_v52  ;;  %v456_v3 = vadd.f32 0.21397123, %v573_v28  ;;  %vm194_vm13 = vcmp.ge.f32.partialorder %v453_v52, 1.7117698 }
  0x53   :  { %vm185_vm11 = vcmp.lt.f32.partialorder %v183_v63, %v165_v53  ;;  %vm186_vm12 = vcmp.lt.f32.partialorder %v184_v0, %v166_v54  ;;  %v457_v4 = vadd.f32 0.21397123, %v575_v29  ;;  %vm235_vm14 = vcmp.ge.f32.partialorder %v573_v28, 1.7117698 }
  0x54   :  { %v187_v5 = vsel %vm185_vm11, %v183_v63, %v165_v53  ;;  %v188_v6 = vsel %vm186_vm12, %v184_v0, %v166_v54  ;;  %v189_v7 = vsel %vm185_vm11, -1.1780974, %v167_v55  ;;  %v190_v8 = vsel %vm186_vm12, -1.1780974, %v168_v56 }
  0x55   :  { %v201_v9 = vsel %vm197_vm9, %v199_v1, %v452_v38  ;;  %v202_v10 = vsel %vm198_vm10, %v200_v2, %v453_v52  ;;  %vm215_vm15 = vcmp.ge.f32.partialorder %v456_v3, 1.7117698  ;;  %v458_v13 = vadd.f32 -3.4235396, %v456_v3 }
  0x56   :  { %v203_v11 = vsel %vm193_vm8, %v454_v59, %v201_v9  ;;  %v204_v12 = vsel %vm194_vm13, %v455_v62, %v202_v10  ;;  %v459_v14 = vadd.f32 -3.4235396, %v457_v4  ;;  %vm219_vm0 = vcmp.lt.f32.partialorder %v456_v3, -1.7117698 }
  0x57   :  { %v205_v15 = vand.u32 2147483647, %v203_v11  ;;  %v206_v16 = vand.u32 2147483647, %v204_v12  ;;  %vm220_vm1 = vcmp.lt.f32.partialorder %v457_v4, -1.7117698 }
  0x58   :  { %v221_v17 = vadd.f32 3.4235396, %v456_v3  ;;  %v222_v18 = vadd.f32 3.4235396, %v457_v4  ;;  %vm216_vm4 = vcmp.ge.f32.partialorder %v457_v4, 1.7117698 }
  0x59   :  { %vm638_vm2 = vcmp.lt.f32.partialorder %v205_v15, %v187_v5  ;;  %vm642_vm3 = vcmp.lt.f32.partialorder %v206_v16, %v188_v6  ;;  %vm236_vm5 = vcmp.ge.f32.partialorder %v575_v29, 1.7117698  ;;  %v460_v24 = vadd.f32 -3.4235396, %v573_v28 }
  0x5a   :  { %v209_v21 = vsel %vm638_vm2, %v205_v15, %v187_v5  ;;  %v210_v22 = vsel %vm642_vm3, %v206_v16, %v188_v6  ;;  %v211_v23 = vsel %vm638_vm2, -0.78539824, %v189_v7  ;;  %v223_v25 = vsel %vm219_vm0, %v221_v17, %v456_v3 }
  0x5b   :  { %v224_v26 = vsel %vm220_vm1, %v222_v18, %v457_v4  ;;  %v461_v27 = vadd.f32 -3.4235396, %v575_v29  ;;  %vm239_vm6 = vcmp.lt.f32.partialorder %v573_v28, -1.7117698  ;;  %v225_v30 = vsel %vm215_vm15, %v458_v13, %v223_v25 }
  0x5c   :  { %v226_v31 = vsel %vm216_vm4, %v459_v14, %v224_v26  ;;  %vm240_vm7 = vcmp.lt.f32.partialorder %v575_v29, -1.7117698  ;;  %v241_v32 = vadd.f32 3.4235396, %v573_v28  ;;  %v227_v33 = vand.u32 2147483647, %v225_v30 }
  0x5d   :  { %v228_v34 = vand.u32 2147483647, %v226_v31  ;;  %v242_v35 = vadd.f32 3.4235396, %v575_v29  ;;  %v212_v36 = vsel %vm642_vm3, -0.78539824, %v190_v8 }
  0x5e   :  { %v243_v37 = vsel %vm239_vm6, %v241_v32, %v573_v28  ;;  %v462_v38 = vadd.f32 -0.21397123, %v573_v28  ;;  %v463_v39 = vadd.f32 -0.21397123, %v575_v29  ;;  %vm229_vm8 = vcmp.lt.f32.partialorder %v227_v33, %v209_v21 }
  0x5f   :  { %vm230_vm9 = vcmp.lt.f32.partialorder %v228_v34, %v210_v22  ;;  %v244_v40 = vsel %vm240_vm7, %v242_v35, %v575_v29  ;;  %v245_v41 = vsel %vm235_vm14, %v460_v24, %v243_v37  ;;  %v231_v42 = vsel %vm229_vm8, %v227_v33, %v209_v21 }
  0x60   :  { %v232_v43 = vsel %vm230_vm9, %v228_v34, %v210_v22  ;;  %v233_v44 = vsel %vm229_vm8, -0.39269906, %v211_v23  ;;  %v466_v45 = vadd.f32 -0.4279425, %v573_v28  ;;  %v234_v46 = vsel %vm230_vm9, -0.39269906, %v212_v36 }
  0x61   :  { %v246_v47 = vsel %vm236_vm5, %v461_v27, %v244_v40  ;;  %v247_v48 = vand.u32 2147483647, %v245_v41  ;;  %vm257_vm10 = vcmp.ge.f32.partialorder %v462_v38, 1.7117698  ;;  %v464_v50 = vadd.f32 -3.4235396, %v462_v38 }
  0x62   :  { %v248_v49 = vand.u32 2147483647, %v246_v47  ;;  %v465_v51 = vadd.f32 -3.4235396, %v463_v39  ;;  %vm261_vm12 = vcmp.lt.f32.partialorder %v462_v38, -1.7117698 }
  0x63   :  { %vm671_vm11 = vcmp.lt.f32.partialorder %v247_v48, %v231_v42  ;;  %vm262_vm13 = vcmp.lt.f32.partialorder %v463_v39, -1.7117698  ;;  %v263_v53 = vadd.f32 3.4235396, %v462_v38  ;;  %vm258_vm15 = vcmp.ge.f32.partialorder %v463_v39, 1.7117698 }
  0x64   :  { %vm675_vm14 = vcmp.lt.f32.partialorder %v248_v49, %v232_v43  ;;  %v251_v55 = vsel %vm671_vm11, %v247_v48, %v231_v42  ;;  %v264_v56 = vadd.f32 3.4235396, %v463_v39  ;;  %v253_v58 = vsel %vm671_vm11, 0.0, %v233_v44 }
  0x65   :  { %v252_v57 = vsel %vm675_vm14, %v248_v49, %v232_v43  ;;  %v265_v59 = vsel %vm261_vm12, %v263_v53, %v462_v38  ;;  %v467_v60 = vadd.f32 -0.4279425, %v575_v29  ;;  %vm279_vm0 = vcmp.ge.f32.partialorder %v466_v45, 1.7117698 }
  0x66   :  { %v266_v61 = vsel %vm262_vm13, %v264_v56, %v463_v39  ;;  %v267_v62 = vsel %vm257_vm10, %v464_v50, %v265_v59  ;;  %v468_v63 = vadd.f32 -3.4235396, %v466_v45  ;;  %vm283_vm2 = vcmp.lt.f32.partialorder %v466_v45, -1.7117698 }
  0x67   :  { %v268_v0 = vsel %vm258_vm15, %v465_v51, %v266_v61  ;;  %v269_v1 = vand.u32 2147483647, %v267_v62  ;;  %vm280_vm1 = vcmp.ge.f32.partialorder %v467_v60, 1.7117698  ;;  %v469_v2 = vadd.f32 -3.4235396, %v467_v60 }
  0x68   :  { %v270_v3 = vand.u32 2147483647, %v268_v0  ;;  %vm284_vm3 = vcmp.lt.f32.partialorder %v467_v60, -1.7117698  ;;  %v285_v4 = vadd.f32 3.4235396, %v466_v45 }
  0x69   :  { %vm271_vm4 = vcmp.lt.f32.partialorder %v269_v1, %v251_v55  ;;  %v286_v5 = vadd.f32 3.4235396, %v467_v60  ;;  %v470_v6 = vadd.f32 -0.6419137, %v573_v28  ;;  %v254_v7 = vsel %vm675_vm14, 0.0, %v234_v46 }
  0x6a   :  { %vm690_vm5 = vcmp.lt.f32.partialorder %v270_v3, %v252_v57  ;;  %v273_v9 = vsel %vm271_vm4, %v269_v1, %v251_v55  ;;  %v471_v10 = vadd.f32 -0.6419137, %v575_v29  ;;  %v275_v12 = vsel %vm271_vm4, 0.39269906, %v253_v58 }
  0x6b   :  { %v274_v11 = vsel %vm690_vm5, %v270_v3, %v252_v57  ;;  %v287_v13 = vsel %vm283_vm2, %v285_v4, %v466_v45  ;;  %v288_v14 = vsel %vm284_vm3, %v286_v5, %v467_v60  ;;  %vm301_vm6 = vcmp.ge.f32.partialorder %v470_v6, 1.7117698 }
  0x6c   :  { %v289_v15 = vsel %vm279_vm0, %v468_v63, %v287_v13  ;;  %v290_v16 = vsel %vm280_vm1, %v469_v2, %v288_v14  ;;  %vm302_vm7 = vcmp.ge.f32.partialorder %v471_v10, 1.7117698  ;;  %v472_v19 = vadd.f32 -3.4235396, %v470_v6 }
  0x6d   :  { %v291_v17 = vand.u32 2147483647, %v289_v15  ;;  %v292_v18 = vand.u32 2147483647, %v290_v16  ;;  %v473_v20 = vadd.f32 -3.4235396, %v471_v10 }
  0x6e   :  { %vm305_vm8 = vcmp.lt.f32.partialorder %v470_v6, -1.7117698  ;;  %vm306_vm9 = vcmp.lt.f32.partialorder %v471_v10, -1.7117698  ;;  %v307_v23 = vadd.f32 3.4235396, %v470_v6 }
  0x6f   :  { %vm699_vm10 = vcmp.lt.f32.partialorder %v291_v17, %v273_v9  ;;  %vm703_vm11 = vcmp.lt.f32.partialorder %v292_v18, %v274_v11  ;;  %v308_v24 = vadd.f32 3.4235396, %v471_v10  ;;  %v276_v25 = vsel %vm690_vm5, 0.39269906, %v254_v7 }
  0x70   :  { %v295_v26 = vsel %vm699_vm10, %v291_v17, %v273_v9  ;;  %v296_v27 = vsel %vm703_vm11, %v292_v18, %v274_v11  ;;  %v309_v30 = vsel %vm305_vm8, %v307_v23, %v470_v6  ;;  %v474_v32 = vadd.f32 -0.85588497, %v573_v28 }
  0x71   :  { %v310_v31 = vsel %vm306_vm9, %v308_v24, %v471_v10  ;;  %v297_v33 = vsel %vm699_vm10, 0.78539824, %v275_v12  ;;  %v311_v34 = vsel %vm301_vm6, %v472_v19, %v309_v30  ;;  %v475_v36 = vadd.f32 -0.85588497, %v575_v29 }
  0x72   :  { %v312_v35 = vsel %vm302_vm7, %v473_v20, %v310_v31  ;;  %v298_v37 = vsel %vm703_vm11, 0.78539824, %v276_v25  ;;  %v313_v38 = vand.u32 2147483647, %v311_v34  ;;  %vm323_vm12 = vcmp.ge.f32.partialorder %v474_v32, 1.7117698 }
  0x73   :  { %v314_v39 = vand.u32 2147483647, %v312_v35  ;;  %v478_v40 = vadd.f32 -1.0698562, %v573_v28  ;;  %v479_v41 = vadd.f32 -1.0698562, %v575_v29 }
  0x74   :  { %vm723_vm13 = vcmp.lt.f32.partialorder %v313_v38, %v295_v26  ;;  %vm324_vm15 = vcmp.ge.f32.partialorder %v475_v36, 1.7117698  ;;  %v476_v44 = vadd.f32 -3.4235396, %v474_v32  ;;  %v477_v45 = vadd.f32 -3.4235396, %v475_v36 }
  0x75   :  { %vm727_vm14 = vcmp.lt.f32.partialorder %v314_v39, %v296_v27  ;;  %vm327_vm0 = vcmp.lt.f32.partialorder %v474_v32, -1.7117698  ;;  %vm328_vm1 = vcmp.lt.f32.partialorder %v475_v36, -1.7117698  ;;  %v317_v46 = vsel %vm723_vm13, %v313_v38, %v295_v26 }
  0x76   :  { %v329_v47 = vadd.f32 3.4235396, %v474_v32  ;;  %v330_v48 = vadd.f32 3.4235396, %v475_v36  ;;  %vm345_vm2 = vcmp.ge.f32.partialorder %v478_v40, 1.7117698  ;;  %v318_v49 = vsel %vm727_vm14, %v314_v39, %v296_v27 }
  0x77   :  { %vm346_vm3 = vcmp.ge.f32.partialorder %v479_v41, 1.7117698  ;;  %v480_v50 = vadd.f32 -3.4235396, %v478_v40  ;;  %v481_v51 = vadd.f32 -3.4235396, %v479_v41 }
  0x78   :  { %v331_v52 = vsel %vm327_vm0, %v329_v47, %v474_v32  ;;  %v332_v53 = vsel %vm328_vm1, %v330_v48, %v475_v36  ;;  %vm349_vm4 = vcmp.lt.f32.partialorder %v478_v40, -1.7117698  ;;  %vm350_vm5 = vcmp.lt.f32.partialorder %v479_v41, -1.7117698 }
  0x79   :  { %v333_v54 = vsel %vm323_vm12, %v476_v44, %v331_v52  ;;  %v334_v55 = vsel %vm324_vm15, %v477_v45, %v332_v53  ;;  %v351_v56 = vadd.f32 3.4235396, %v478_v40  ;;  %v352_v57 = vadd.f32 3.4235396, %v479_v41 }
  0x7a   :  { %v319_v58 = vsel %vm723_vm13, 1.1780972, %v297_v33  ;;  %v335_v59 = vand.u32 2147483647, %v333_v54  ;;  %v336_v60 = vand.u32 2147483647, %v334_v55 }
  0x7b   :  { %v320_v61 = vsel %vm727_vm14, 1.1780972, %v298_v37  ;;  %v353_v62 = vsel %vm349_vm4, %v351_v56, %v478_v40  ;;  %v354_v63 = vsel %vm350_vm5, %v352_v57, %v479_v41  ;;  %v482_v0 = vadd.f32 -1.2838274, %v573_v28 }
  0x7c   :  { %vm742_vm6 = vcmp.lt.f32.partialorder %v335_v59, %v317_v46  ;;  %vm746_vm7 = vcmp.lt.f32.partialorder %v336_v60, %v318_v49  ;;  %v355_v3 = vsel %vm345_vm2, %v480_v50, %v353_v62  ;;  %v356_v4 = vsel %vm346_vm3, %v481_v51, %v354_v63 }
  0x7d   :  { %v339_v5 = vsel %vm742_vm6, %v335_v59, %v317_v46  ;;  %v340_v6 = vsel %vm746_vm7, %v336_v60, %v318_v49  ;;  %v483_v7 = vadd.f32 -1.2838274, %v575_v29  ;;  %v357_v8 = vand.u32 2147483647, %v355_v3 }
  0x7e   :  { %v358_v9 = vand.u32 2147483647, %v356_v4  ;;  %v486_v10 = vadd.f32 -1.4977987, %v573_v28  ;;  %v341_v11 = vsel %vm742_vm6, 1.5707964, %v319_v58 }
  0x7f   :  { %v342_v12 = vsel %vm746_vm7, 1.5707964, %v320_v61  ;;  %vm367_vm8 = vcmp.ge.f32.partialorder %v482_v0, 1.7117698  ;;  %vm762_vm9 = vcmp.lt.f32.partialorder %v357_v8, %v339_v5  ;;  %vm368_vm11 = vcmp.ge.f32.partialorder %v483_v7, 1.7117698 }
  0x80   :  { %vm766_vm10 = vcmp.lt.f32.partialorder %v358_v9, %v340_v6  ;;  %v484_v15 = vadd.f32 -3.4235396, %v482_v0  ;;  %v485_v16 = vadd.f32 -3.4235396, %v483_v7  ;;  %vm371_vm12 = vcmp.lt.f32.partialorder %v482_v0, -1.7117698 }
  0x81   :  { %vm372_vm13 = vcmp.lt.f32.partialorder %v483_v7, -1.7117698  ;;  %v373_v28 = vadd.f32 3.4235396, %v482_v0  ;;  %v374_v17 = vadd.f32 3.4235396, %v483_v7  ;;  %v361_v19 = vsel %vm762_vm9, %v357_v8, %v339_v5 }
  0x82   :  { %v487_v18 = vadd.f32 -1.4977987, %v575_v29  ;;  %v362_v20 = vsel %vm766_vm10, %v358_v9, %v340_v6  ;;  %vm389_vm14 = vcmp.ge.f32.partialorder %v486_v10, 1.7117698  ;;  %v488_v21 = vadd.f32 -3.4235396, %v486_v10 }
  0x83   :  { %v375_v22 = vsel %vm371_vm12, %v373_v28, %v482_v0  ;;  %v376_v23 = vsel %vm372_vm13, %v374_v17, %v483_v7  ;;  %vm393_vm15 = vcmp.lt.f32.partialorder %v486_v10, -1.7117698  ;;  %v395_v27 = vadd.f32 3.4235396, %v486_v10 }
  0x84   :  { %v489_v24 = vadd.f32 -3.4235396, %v487_v18  ;;  %v377_v25 = vsel %vm367_vm8, %v484_v15, %v375_v22  ;;  %v378_v26 = vsel %vm368_vm11, %v485_v16, %v376_v23  ;;  %vm394_vm0 = vcmp.lt.f32.partialorder %v487_v18, -1.7117698 }
  0x85   :  { %v379_v30 = vand.u32 2147483647, %v377_v25  ;;  %v380_v29 = vand.u32 2147483647, %v378_v26  ;;  %v396_v31 = vadd.f32 3.4235396, %v487_v18  ;;  %v397_v34 = vsel %vm393_vm15, %v395_v27, %v486_v10 }
  0x86   :  { %v363_v32 = vsel %vm762_vm9, 1.9634955, %v341_v11  ;;  %v364_v33 = vsel %vm766_vm10, 1.9634955, %v342_v12  ;;  %vm390_vm1 = vcmp.ge.f32.partialorder %v487_v18, 1.7117698  ;;  %v399_v38 = vsel %vm389_vm14, %v488_v21, %v397_v34 }
  0x87   :  { %vm781_vm2 = vcmp.lt.f32.partialorder %v379_v30, %v361_v19  ;;  %vm785_vm3 = vcmp.lt.f32.partialorder %v380_v29, %v362_v20  ;;  %v398_v37 = vsel %vm394_vm0, %v396_v31, %v487_v18  ;;  %v401_v43 = vand.u32 2147483647, %v399_v38 }
  0x88   :  { %v383_v39 = vsel %vm781_vm2, %v379_v30, %v361_v19  ;;  %v384_v40 = vsel %vm785_vm3, %v380_v29, %v362_v20  ;;  %v385_v41 = vsel %vm781_vm2, 2.3561945, %v363_v32  ;;  %v400_v42 = vsel %vm390_vm1, %v489_v24, %v398_v37 }
  0x89   :  { %v386_v44 = vsel %vm785_vm3, 2.3561945, %v364_v33  ;;  %v402_v45 = vand.u32 2147483647, %v400_v42  ;;  %vm403_vm4 = vcmp.lt.f32.partialorder %v401_v43, %v383_v39 }
  0x8a   :  { %v405_v46 = vsel %vm403_vm4, 2.7488937, %v385_v41 }
  0x8b   :  { %vm404_vm5 = vcmp.lt.f32.partialorder %v402_v45, %v384_v40  ;;  %407 = vst [vmem:[#allocation5] sm:$0xff] %v405_v46 }
  0x8c   :  { %v406_v47 = vsel %vm404_vm5, 2.7488937, %v386_v44 }
  0x8d   :  { %408 = vst [vmem:[#allocation5 + $0x8] sm:$0xff] %v406_v47 }
  0x8e   :  { %528 = shalt.err (!%p525_p12)
}
  0x8f   :  { %s529_s24 = scalar_lea.hbm %s814_s1, 256 }
  0x90   :  { %p530_p13 = scmp.ne.s32.totalorder %s814_s1, %s529_s24  ;;  %p533_p0 = scmp.lt.u32.totalorder %s529_s24, %s814_s1 }
  0x92   :  { %p535_p1 = pnand %p533_p0, %p530_p13 }
  0x94   :  { %538 = shalt.err (!%p535_p1)
}
  0x95   :  { %420 = dma.vmem_to_hbm [thread:$0]  %s415_s20, 256, %s814_s1, [#allocation4], %s544_s16, %s544_s16, %s545_s17  }
  0x96   :  { %541 = dma.done.wait [#allocation4], 256  }
  0x97   :  { %542 = vsyncadd [#allocation4], 4294967040 }
  0x98   :  { %424 = vsyncpa [#allocation3], 1 }
  0x99   :  { %425 = vsyncpa [#allocation4], 1 }

</bundles_post_ra>
